<compile_context>
chip_gen: v6e
topology: v6e:2x2x1
jax: 0.10.0
libtpu: 0.0.40
codegen_flags: <defaults>
</compile_context>

<pallas_src>
import jax
import jax.numpy as jnp
from jax import lax
from jax.experimental import pallas as pl
from jax.experimental.pallas import tpu as pltpu


# ----------------------------- kernel bodies --------------------------------

def _partial_decode(x_ref, w_ref, b_ref):
    """relu(x @ w_tile.T + b_tile) @ w_tile for the current H tile; f32 (tb, D)."""
    h_idx = pl.program_id(1)
    x = x_ref[...]                       # (tb, D)
    w = w_ref[...]                       # (th, D)  tied weight tile, streamed over H
    b = b_ref[pl.ds(h_idx, 1), :]        # (1, th)  resident bias, row = current H tile

    # encode partial: contract on D (last axis of both) -> (tb, th); no transpose copy.
    z = lax.dot_general(
        x, w,
        dimension_numbers=(((1,), (1,)), ((), ())),
        preferred_element_type=jnp.float32,
    )
    z = jnp.maximum(z + b, 0.0)          # ReLU is elementwise over H -> exact per tile

    # decode partial (tied weights): (tb, th) @ (th, D), f32 accumulate.
    return lax.dot_general(
        z.astype(w.dtype), w,
        dimension_numbers=(((1,), (0,)), ((), ())),
        preferred_element_type=jnp.float32,
    )


def sae_kernel_inplace(x_ref, w_ref, b_ref, out_ref):
    """f32 output: accumulate partial decodes directly into the resident out block."""
    h_idx = pl.program_id(1)
    p = _partial_decode(x_ref, w_ref, b_ref)

    @pl.when(h_idx == 0)
    def _():
        out_ref[...] = p

    @pl.when(h_idx != 0)
    def _():
        out_ref[...] += p


def sae_kernel_acc(x_ref, w_ref, b_ref, out_ref, acc_ref):
    """non-f32 output: f32 scratch accumulator, last partial folded into final store."""
    h_idx = pl.program_id(1)
    last = pl.num_programs(1) - 1
    p = _partial_decode(x_ref, w_ref, b_ref)

    @pl.when(h_idx == 0)
    def _():
        acc_ref[...] = jnp.zeros_like(acc_ref)

    @pl.when(h_idx != last)
    def _():
        acc_ref[...] += p

    @pl.when(h_idx == last)
    def _():
        out_ref[...] = (acc_ref[...] + p).astype(out_ref.dtype)


# ------------------------------- wrapper -------------------------------------

def _pick_tile(total, preferred, align):
    """Largest multiple of `align` that divides `total` and is <= preferred."""
    if total <= align:
        return total
    t = min(preferred, total)
    t = max(align, (t // align) * align)
    while t > align and total % t != 0:
        t -= align
    if total % t != 0:
        t = total
    return t


def _tpu_vmem_capacity_bytes():
    try:
        return int(pltpu.get_tpu_info().vmem_capacity_bytes)
    except Exception:
        pass
    try:
        kind = (getattr(jax.devices()[0], "device_kind", "") or "").lower()
        if "7" in kind:           # v7x: 64 MiB VMEM per TensorCore
            return 64 << 20
    except Exception:
        pass
    return 128 << 20              # v5e / v6e


def _num_tensorcores_per_chip():
    try:
        kind = (getattr(jax.devices()[0], "device_kind", "") or "").lower()
        if "7" in kind:           # v7x exposes 2 TensorCores behind one chip
            return 2
    except Exception:
        pass
    return 1


def sae_forward(x, w_enc, b_enc, *, tb=None, th=None,
                compute_dtype=jnp.bfloat16, vmem_budget_bytes=None):
    """decoded = relu(x @ w_enc.T + b_enc) @ w_enc  (tied decoder weights).

    x: (B, D); w_enc: (H, D); b_enc: (H,). Returns (B, D) in x's original dtype.
    compute_dtype=bf16 (default) casts x/W to bf16 with f32 accumulation (~1e-2
    relative error vs f32); pass compute_dtype=jnp.float32 (or None) for exact f32.
    """
    B, D = x.shape
    H, D2 = w_enc.shape
    assert D2 == D and b_enc.shape == (H,)
    assert B % 8 == 0, "batch must be a multiple of 8"
    assert D % 128 == 0 and H % 128 == 0, "pad D and H to multiples of 128"

    out_dtype = x.dtype
    cd = x.dtype if compute_dtype is None else jnp.dtype(compute_dtype)
    x = x.astype(cd)
    w_enc = w_enc.astype(cd)

    x_bytes = jnp.dtype(x.dtype).itemsize
    w_bytes = jnp.dtype(w_enc.dtype).itemsize
    o_bytes = jnp.dtype(out_dtype).itemsize

    vmem_cap = _tpu_vmem_capacity_bytes()
    if vmem_budget_bytes is None:
        # ~70% of physical VMEM: ~90 MiB on 128 MiB parts, ~45 MiB on v7x's 64 MiB.
        vmem_budget_bytes = (vmem_cap * 7) // 10

    # batch-tile alignment: 16 sublanes per vreg for 16-bit compute, else 8.
    b_align = 16 if (x_bytes == 2 and B % 16 == 0) else 8
    if tb is None:
        tb_cap = 512                       # amortize weight re-streaming past roofline ridge
        if _num_tensorcores_per_chip() >= 2 and B >= 2 * b_align:
            tb_cap = min(tb_cap, B // 2)   # >= 2 batch tiles so both v7x cores are busy
        tb = _pick_tile(B, tb_cap, b_align)
    if th is None:
        th = _pick_tile(H, 1024, 128)      # fewest H steps that fit the budget
    assert B % tb == 0 and H % th == 0, "tb/th must divide B/H"

    use_acc = out_dtype != jnp.float32

    def vmem_estimate(tb_, th_):
        return (2 * tb_ * D * x_bytes            # double-buffered x blocks
                + 2 * th_ * D * w_bytes          # double-buffered weight tiles
                + 2 * H * 4                      # resident f32 bias (conservative x2)
                + 2 * tb_ * D * o_bytes          # output blocks at out_dtype size
                + (tb_ * D * 4 if use_acc else 0)   # f32 accumulator scratch
                + tb_ * th_ * 4                  # encode intermediate z
                + tb_ * D * 4)                   # f32 partial decode

    # Shrink th first (tb is the weight-reuse knob), then tb, to fit the budget.
    while vmem_estimate(tb, th) > vmem_budget_bytes and th > 128:
        th = _pick_tile(H, th - 128, 128)
    while vmem_estimate(tb, th) > vmem_budget_bytes and tb > b_align:
        tb = _pick_tile(B, tb - b_align, b_align)

    grid = (B // tb, H // th)
    est = vmem_estimate(tb, th)

    # Bias resident in VMEM: row h holds the bias slice for H tile h.
    b2d = b_enc.astype(jnp.float32).reshape(H // th, th)

    flops = 4 * B * H * D                        # encode + decode matmuls
    bytes_accessed = (B * D * x_bytes            # read x
                      + grid[0] * H * D * w_bytes  # weight re-streamed per batch tile
                      + H * 4                      # bias
                      + B * D * o_bytes)           # write decoded

    kernel = sae_kernel_acc if use_acc else sae_kernel_inplace
    scratch = [pltpu.VMEM((tb, D), jnp.float32)] if use_acc else []

    # Keep >= 16 MiB headroom below physical VMEM (v7x-safe), floor at 32 MiB.
    vmem_limit = int(max(32 << 20, min(vmem_cap - (16 << 20), est + (16 << 20))))

    return pl.pallas_call(
        kernel,
        out_shape=jax.ShapeDtypeStruct((B, D), out_dtype),
        grid_spec=pltpu.PrefetchScalarGridSpec(
            num_scalar_prefetch=0,
            grid=grid,
            in_specs=[
                pl.BlockSpec((tb, D), lambda i, h: (i, 0)),        # x block, resident over h
                pl.BlockSpec((th, D), lambda i, h: (h, 0)),        # weight tile, streamed over H
                pl.BlockSpec((H // th, th), lambda i, h: (0, 0)),  # full bias, resident in VMEM
            ],
            out_specs=pl.BlockSpec((tb, D), lambda i, h: (i, 0)),
            scratch_shapes=scratch,
        ),
        compiler_params=pltpu.CompilerParams(
            dimension_semantics=("parallel", "arbitrary"),
            vmem_limit_bytes=vmem_limit,
        ),
        cost_estimate=pl.CostEstimate(
            flops=flops, transcendentals=0, bytes_accessed=bytes_accessed),
    )(x, w_enc, b2d)


# --------------------------------- test ---------------------------------------

if __name__ == "__main__":
    # Small shapes consistent with forward(x) where x is (batch, input_size).
    batch, input_size, hidden_size = 32, 256, 256

    key = jax.random.PRNGKey(0)
    kx, kw, kbias = jax.random.split(key, 3)

    x = jax.random.normal(kx, (batch, input_size), dtype=jnp.float32)
    w_enc = jax.random.normal(kw, (hidden_size, input_size), dtype=jnp.float32) * 0.05
    b_enc = jnp.zeros((hidden_size,), dtype=jnp.float32)   # encoder.bias = zeros
    # self.bias is declared in the module but never used in forward(); not applied.
    _unused_bias = jax.random.normal(kbias, (input_size,), dtype=jnp.float32)

    ref = jnp.maximum(x @ w_enc.T + b_enc, 0.0) @ w_enc

    # 1) exact f32 path with small explicit tiles (exercises the H-accumulation grid
    #    and the in-place f32 output accumulator).
    dec_f32 = jax.block_until_ready(
        sae_forward(x, w_enc, b_enc, tb=8, th=128, compute_dtype=jnp.float32))
    assert dec_f32.shape == (batch, input_size)
    assert jnp.allclose(dec_f32, ref, atol=1e-4, rtol=1e-4), "f32 path mismatch"

    # 2) default path: auto-tiled, bf16 compute with f32 accumulation.
    dec_def = jax.block_until_ready(sae_forward(x, w_enc, b_enc))
    rel_err = jnp.linalg.norm(dec_def.astype(jnp.float32) - ref) / jnp.linalg.norm(ref)
    assert dec_def.shape == (batch, input_size)
    assert float(rel_err) < 1e-2, f"bf16 rel err too high: {rel_err}"

    # 3) bf16 in/out path with explicit tiles (exercises the scratch-accumulator kernel).
    dec_bf = jax.block_until_ready(
        sae_forward(x.astype(jnp.bfloat16), w_enc.astype(jnp.bfloat16), b_enc,
                    tb=16, th=128))
    rel_err_bf = (jnp.linalg.norm(dec_bf.astype(jnp.float32) - ref)
                  / jnp.linalg.norm(ref))
    assert dec_bf.shape == (batch, input_size)
    assert float(rel_err_bf) < 2e-2, f"bf16 io rel err too high: {rel_err_bf}"

    print("KERNEL_OK")
</pallas_src>

<mosaic_0001>
module attributes {stable_mosaic.version = 11 : i64} {
  func.func @sae_kernel_inplace(%arg0: i32, %arg1: i32, %arg2: memref<8x256xf32, #tpu.memory_space<vmem>>, %arg3: memref<128x256xf32, #tpu.memory_space<vmem>>, %arg4: memref<2x128xf32, #tpu.memory_space<vmem>>, %arg5: memref<8x256xf32, #tpu.memory_space<vmem>>) attributes {dimension_semantics = [#tpu.dimension_semantics<parallel>, #tpu.dimension_semantics<arbitrary>], iteration_bounds = array<i64: 4, 2>, scalar_prefetch = 0 : i64, scratch_operands = 0 : i64, tpu.core_type = #tpu.core_type<tc>, window_params = [{transform_indices = @transform_0, window_bounds = array<i64: 8, 256>}, {transform_indices = @transform_1, window_bounds = array<i64: 128, 256>}, {pipeline_mode = #tpu.pipeline_mode<synchronous>, transform_indices = @transform_2, window_bounds = array<i64: 2, 128>}, {transform_indices = @transform_3, window_bounds = array<i64: 8, 256>}]} {
    %c0 = arith.constant 0 : index
    %c0_0 = arith.constant 0 : index
    %0 = vector.load %arg2[%c0, %c0_0] : memref<8x256xf32, #tpu.memory_space<vmem>>, vector<8x256xf32>
    %c0_1 = arith.constant 0 : index
    %c0_2 = arith.constant 0 : index
    %1 = vector.load %arg3[%c0_1, %c0_2] : memref<128x256xf32, #tpu.memory_space<vmem>>, vector<128x256xf32>
    %2 = arith.index_cast %arg1 : i32 to index
    %c0_3 = arith.constant 0 : index
    %3 = vector.load %arg4[%2, %c0_3] : memref<2x128xf32, #tpu.memory_space<vmem>>, vector<1x128xf32>
    %cst = arith.constant dense<0.000000e+00> : vector<8x128xf32>
    %4 = tpu.matmul %0, %1, %cst {dimension_numbers = #tpu.dot_dimension_numbers<[1], [1], [0], [0], [0, 0, 1, 0], [], []>} : vector<8x256xf32>, vector<128x256xf32>, vector<8x128xf32> -> vector<8x128xf32>
    %5 = vector.broadcast %3 : vector<1x128xf32> to vector<8x128xf32>
    %6 = arith.addf %4, %5 : vector<8x128xf32>
    %cst_4 = arith.constant 0.000000e+00 : f32
    %7 = vector.broadcast %cst_4 : f32 to vector<8x128xf32>
    %8 = arith.maximumf %6, %7 : vector<8x128xf32>
    %cst_5 = arith.constant dense<0.000000e+00> : vector<8x256xf32>
    %9 = tpu.matmul %8, %1, %cst_5 {dimension_numbers = #tpu.dot_dimension_numbers<[1], [0], [0], [1], [0, 0, 1, 1], [], []>} : vector<8x128xf32>, vector<128x256xf32>, vector<8x256xf32> -> vector<8x256xf32>
    %c0_i32 = arith.constant 0 : i32
    %10 = arith.cmpi eq, %arg1, %c0_i32 : i32
    %11 = arith.extui %10 : i1 to i32
    %c0_i32_6 = arith.constant 0 : i32
    %12 = arith.cmpi ne, %11, %c0_i32_6 : i32
    scf.if %12 {
      %c0_9 = arith.constant 0 : index
      %c0_10 = arith.constant 0 : index
      %16 = vector.load %arg5[%c0_9, %c0_10] : memref<8x256xf32, #tpu.memory_space<vmem>>, vector<8x256xf32>
      tpu.vector_store %arg5[%c0_9, %c0_10], %9 {strides = array<i32>} : memref<8x256xf32, #tpu.memory_space<vmem>>, vector<8x256xf32>,
    } else {
    }
    %c0_i32_7 = arith.constant 0 : i32
    %13 = arith.cmpi ne, %arg1, %c0_i32_7 : i32
    %14 = arith.extui %13 : i1 to i32
    %c0_i32_8 = arith.constant 0 : i32
    %15 = arith.cmpi ne, %14, %c0_i32_8 : i32
    scf.if %15 {
      %c0_9 = arith.constant 0 : index
      %c0_10 = arith.constant 0 : index
      %16 = vector.load %arg5[%c0_9, %c0_10] : memref<8x256xf32, #tpu.memory_space<vmem>>, vector<8x256xf32>
      %17 = arith.addf %16, %9 : vector<8x256xf32>
      %c0_11 = arith.constant 0 : index
      %c0_12 = arith.constant 0 : index
      %18 = vector.load %arg5[%c0_11, %c0_12] : memref<8x256xf32, #tpu.memory_space<vmem>>, vector<8x256xf32>
      tpu.vector_store %arg5[%c0_11, %c0_12], %17 {strides = array<i32>} : memref<8x256xf32, #tpu.memory_space<vmem>>, vector<8x256xf32>,
    } else {
    }
    return
  }
  func.func @transform_0(%arg0: i32, %arg1: i32) -> (i32, i32) {
    %c0_i32 = arith.constant 0 : i32
    %c0_i32_0 = arith.constant 0 : i32
    return %arg0, %c0_i32 : i32, i32
  }
  func.func @transform_1(%arg0: i32, %arg1: i32) -> (i32, i32) {
    %c0_i32 = arith.constant 0 : i32
    %c0_i32_0 = arith.constant 0 : i32
    return %arg1, %c0_i32 : i32, i32
  }
  func.func @transform_2(%arg0: i32, %arg1: i32) -> (i32, i32) {
    %c0_i32 = arith.constant 0 : i32
    %c0_i32_0 = arith.constant 0 : i32
    %c0_i32_1 = arith.constant 0 : i32
    return %c0_i32, %c0_i32_0 : i32, i32
  }
  func.func @transform_3(%arg0: i32, %arg1: i32) -> (i32, i32) {
    %c0_i32 = arith.constant 0 : i32
    %c0_i32_0 = arith.constant 0 : i32
    return %arg0, %c0_i32 : i32, i32
  }
}

</mosaic_0001>

<bundles_post_ra>
// kernel: tpu_custom_call.1
= control target key start
LH: loop header
LB: loop body
LE: loop exit
PB: predicated region body
PF: predicated region fallthrough
CT: control target
= control target key end

     0   :  { %s1174_s0 = inlined_call_operand.hbm [shape: f32[32,256], index: 0, kind: input, shape index: {}]   ;;  %s1175_s1 = inlined_call_operand.hbm [shape: f32[256,256], index: 1, kind: input, shape index: {}]   ;;  %s1176_s2 = inlined_call_operand.vmem [shape: f32[2,128], index: 2, kind: input, shape index: {}]   ;;  %s1177_s3 = inlined_call_operand.hbm [shape: f32[32,256], index: 3, kind: output, shape index: {}]  }
   0x1   :  { %1186 = sst [smem:[#allocation15_spill]] %s1174_s0 }
   0x2   :  { %1187 = sst [smem:[#allocation16_spill]] %s1177_s3 }
   0x3   :  { %8 = vsyncpa [#allocation3], 0 }
   0x4   :  { %10 = vsyncpa [#allocation3 + $0x1], 0 }
   0x5   :  { %11 = vsyncpa [#allocation6], 0 }
   0x6   :  { %13 = vsyncpa [#allocation6 + $0x1], 0 }
   0x7   :  { %14 = vsyncpa [#allocation4], 0 }
   0x8   :  { %16 = vsyncpa [#allocation4 + $0x1], 0  ;;  %s904_s12 = smov 0   ;;  %s906_s13 = smov 0  }
   0x9   :  { %s908_s14 = smov 0   ;;  %s910_s15 = smov 0  }
   0xa   :  { %s912_s16 = smov 0   ;;  %s914_s17 = smov 0  }
   0xb   :  { %s916_s18 = smov 0   ;;  %s918_s19 = smov 0  }
   0xc   :  { %s920_s20 = smov 0   ;;  %s922_s21 = smov 0  }
   0xd   :  { %s924_s22 = smov 0  }
   0xe LB: > { %1188 = sst [smem:[#allocation11_spill]] %s848_s15  ;;  %s559_s23 = sadd.s32 4294967295, %s876_s22   ;;  %s876_s22 = sphi %s924_s22, %s22_s22   ;;  %s872_s21 = sphi %s922_s21, %s1222_s21   ;;  %s868_s20 = sphi %s920_s20, %s1221_s20   ;;  %s864_s19 = sphi %s918_s19, %s1220_s19   ;;  %s860_s18 = sphi %s916_s18, %s1219_s18   ;;  %s856_s17 = sphi %s914_s17, %s1218_s17   ;;  %s852_s16 = sphi %s912_s16, %s1217_s16   ;;  %s848_s15 = sphi %s910_s15, %s1216_s15   ;;  %s844_s14 = sphi %s908_s14, %s1215_s14   ;;  %s840_s13 = sphi %s906_s13, %s1214_s13   ;;  %s836_s12 = sphi %s904_s12, %s1213_s12  }
   0xf   : > { %1189 = sst [smem:[#allocation12_spill]] %s876_s22  ;;  %s560_s24 = sadd.s32 4294967294, %s876_s22  }
  0x10   : > { %p48_p0 = scmp.ne.s32.totalorder %s856_s17, %s852_s16  ;;  %p49_p1 = scmp.eq.s32.totalorder %s876_s22, 0 }
  0x11   : > { %p54_p2 = scmp.ne.s32.totalorder %s852_s16, %s848_s15  ;;  %p55_p3 = scmp.eq.s32.totalorder %s559_s23, 0 }
  0x12   : > { %p966_p4 = por %p49_p1, %p48_p0  ;;  %p74_p5 = scmp.ne.s32.totalorder %s844_s14, %s840_s13 }
  0x13   : > { %p972_p6 = por %p55_p3, %p54_p2  ;;  %p80_p7 = scmp.ne.s32.totalorder %s840_s13, %s836_s12 }
  0x14   : > { %p977_p8 = por %p74_p5, %p49_p1  ;;  %p125_p9 = scmp.eq.s32.totalorder %s559_s23, 7 }
  0x15   : > { %p981_p10 = por %p80_p7, %p55_p3  ;;  %p131_p11 = scmp.eq.s32.totalorder %s560_s24, 7 }
  0x16   : > { %p985_p12 = por %p125_p9, %p48_p0  ;;  %p603_p1 = scmp.lt.s32.totalorder %s876_s22, 8 }
  0x17   : > { %s1193_s30 = scalar_select %p981_p10, 1, 0 }
  0x18   : > { %s1194_s4 = scalar_select %p985_p12, 1, 0 }
  0x19   : > { %p989_p13 = por %p131_p11, %p54_p2  ;;  %s154_s6 = sand.u32 1, %s856_s17  }
  0x1a   : > { %s582_s7 = sshll.u32 %s872_s21, 8  ;;  %s563_s8 = sshll.u32 %s154_s6, 4 }
  0x1b   : > { %s1195_s5 = scalar_select %p989_p13, 1, 0 }
  0x1c   : > { %s1197_s0 = sld [smem:[#allocation15_spill]]  ;;  %s158_s12 = scalar_lea.vmem [#allocation2], %s563_s8 }
  0x1d   : > { %1196 = sst [smem:[#allocation13_spill]] %s1195_s5  ;;  %s166_s23 = sshll.u32 %s158_s12, 4  ;;  %s167_s23 = int_to_ptr.vmem [resolvable:$true] %s166_s23 }
  0x1e   : > { %p1001_p3 = pnand %p603_p1, %p966_p4  ;;  %p1007_p0 = pnand %p603_p1, %p977_p8 }
  0x1f   : > { %p570_p2 = scmp.ge.s32.totalorder %s876_s22, 1  ;;  %s155_s25 = scalar_lea.sflag [#allocation3], %s154_s6 }
  0x20   : > { %p698_p5 = pneg %p1001_p3  ;;  %s709_s9 = scalar_lea.vmem %s167_s23, 256 }
  0x21   : > { %p710_p7 = scmp.ne.s32.totalorder %s167_s23, %s709_s9  ;;  %s878_s27 = smov [#allocation2]  }
  0x22   : > { %s164_s11 = scalar_lea.hbm %s1197_s0, %s582_s7  ;;  %s714_s7 = sshll.u32 %s878_s27, 4  ;;  %s715_s7 = int_to_ptr.vmem [resolvable:$false] %s714_s7 }
  0x23   : > { %p712_p9 = pnand %p710_p7, %p698_p5  ;;  %s716_s8 = scalar_lea.vmem %s715_s7, 512 }
  0x24   : > { %p717_p4 = scmp.lt.s32.totalorder %s167_s23, %s715_s7  ;;  %p718_p13 = scmp.lt.s32.totalorder %s716_s8, %s709_s9 }
  0x25   : > { %p713_p11 = pneg %p712_p9 }
  0x26   : > { %p719_p12 = por %p718_p13, %p717_p4 }
  0x28   : > { %p720_p10 = pnand %p719_p12, %p713_p11 }
  0x2a   : > { %723 = shalt.err (!%p720_p10)
}
  0x2b   : > { %595 = dma.hbm_to_vmem [thread:$0]  (!%p1001_p3), %s164_s11, 256, %s167_s23, %s155_s25  }
  0x2c   : > { %p193_p8 = scmp.lt.s32.totalorder %s876_s22, 9  ;;  %s67_s29 = sadd.s32 1, %s844_s14 }
  0x2d   : > { %s31_s10 = sadd.s32 1, %s868_s20  ;;  %s173_s12 = sand.u32 1, %s844_s14  }
  0x2e   : > { %p1020_p1 = pnand %p570_p2, %p193_p8  ;;  %p32_p10 = scmp.ge.s32.totalorder %s31_s10, 2 }
  0x2f   : > { %s566_s24 = sshll.u32 %s173_s12, 8  ;;  %s584_s9 = sshll.u32 %s868_s20, 12 }
  0x30   : > { %s1224_s10 = smov (%p32_p10, %s31_s10), 0  ;;  %s1202_s25 = sadd.s32 1, %s872_s21 }
  0x31   : > { %1201 = sst [smem:[#allocation14_spill]] %s1224_s10  ;;  %s1226_s25 = smov (!%p32_p10, %s1202_s25), %s872_s21 }
  0x32   : > { %s64_s11 = ssub.s32 %s868_s20, %s1224_s10  ;;  %p36_p12 = scmp.ge.s32.totalorder %s1226_s25, 4 }
  0x33   : > { %p65_p13 = scmp.eq.s32.totalorder %s64_s11, 0  ;;  %s1037_s7 = scalar_lea.hbm %s1175_s1, %s584_s9 }
  0x34   : > { %s177_s8 = scalar_lea.vmem [#allocation5], %s566_s24  ;;  %s1228_s25 = smov (%p36_p12, %s1226_s25), 0 }
  0x35   : > { %s185_s0 = sshll.u32 %s177_s8, 4  ;;  %s38_s15 = ssub.s32 %s872_s21, %s1228_s25  ;;  %s186_s0 = int_to_ptr.vmem [resolvable:$true] %s185_s0 }
  0x36   : > { %s1042_s5 = scalar_select %p65_p13, %s844_s14, %s67_s29  }
  0x37   : > { %p39_p3 = scmp.eq.s32.totalorder %s38_s15, 0  ;;  %s1203_s22 = sadd.s32 1, %s856_s17 }
  0x38   : > { %s174_s10 = scalar_lea.sflag [#allocation6], %s173_s12  ;;  %p726_p2 = pneg %p1007_p0 }
  0x39   : > { %s1049_s3 = scalar_select %p39_p3, %s856_s17, %s1203_s22  }
  0x3a   : > { %s737_s11 = scalar_lea.vmem %s186_s0, 4096  ;;  %s879_s24 = smov [#allocation5]  }
  0x3b   : > { %p738_p5 = scmp.ne.s32.totalorder %s186_s0, %s737_s11  ;;  %s742_s9 = sshll.u32 %s879_s24, 4  ;;  %s743_s9 = int_to_ptr.vmem [resolvable:$false] %s742_s9 }
  0x3c   : > { %s744_s23 = scalar_lea.vmem %s743_s9, 8192  ;;  %p745_p11 = scmp.lt.s32.totalorder %s186_s0, %s743_s9 }
  0x3d   : > { %p740_p7 = pnand %p738_p5, %p726_p2  ;;  %p746_p4 = scmp.lt.s32.totalorder %s744_s23, %s737_s11 }
  0x3f   : > { %p741_p9 = pneg %p740_p7  ;;  %p747_p8 = por %p746_p4, %p745_p11 }
  0x41   : > { %p748_p10 = pnand %p747_p8, %p741_p9 }
  0x43   : > { %751 = shalt.err (!%p748_p10)
}
  0x44   : > { %s880_s15 = smov 256   ;;  %s881_s22 = smov 16  }
  0x45   : > { %598 = dma.hbm_to_vmem [thread:$0]  (!%p1007_p0), %s1037_s7, 4096, %s186_s0, %s174_s10, %s880_s15, %s880_s15, %s881_s22  }
  0x46   : > { %197 = sbr.rel (%p1020_p1) target bundleno = 575 (0x23f), region = 32  ;;  %s1059_s29 = sand.u32 (!%p1020_p1), 1, %s852_s16  }
  0x47   : > { %s571_s12 = sshll.u32 (!%p1020_p1), %s1059_s29, 4  ;;  %s200_s27 = scalar_lea.sflag (!%p1020_p1), [#allocation3], %s1059_s29 }
  0x48   : > { %s1065_s8 = scalar_lea.vmem (!%p1020_p1), [#allocation2], %s571_s12 }
  0x4b   : > { %823 = dma.done.wait (%p972_p6), %s200_s27, 256  }
  0x4c   : > { %825 = vsyncadd (%p972_p6), %s200_s27, 4294967040  ;;  %s208_s0 = sand.u32 1, %s840_s13   ;;  %p1204_p0 = scmp.ne.s32.totalorder %s1193_s30, 0 }
  0x4d   : > { %s572_s26 = sshll.u32 %s208_s0, 8  ;;  %s209_s6 = scalar_lea.sflag [#allocation6], %s208_s0 }
  0x4e   : > { %s1072_s10 = scalar_lea.vmem [#allocation5], %s572_s26 }
  0x4f   : > { %827 = dma.done.wait (%p1204_p0), %s209_s6, 4096  }
  0x50   : > { %829 = vsyncadd (%p1204_p0), %s209_s6, 4294963200  ;;  %v274_v0 = vld [vmem:[%s1072_s10 + $0xf8] sm:$0xff]  ;;  %v273_v1 = vld [vmem:[%s1072_s10 + $0xf0] sm:$0xff]  ;;  %v882_v34 = vmov 0.0   ;;  %s275_s7 = scalar_lea.vmem %s1176_s2, %s860_s18  ;;  %s239_s11 = scalar_lea.vmem [#allocation7], %s571_s12 }
  0x51   : > { %v272_v2 = vld [vmem:[%s1072_s10 + $0xe8] sm:$0xff]  ;;  %281 = vmatprep.subr.mxu0 %v274_v0  ;;  %352 = vmatprep.subr.mxu1 %v274_v0  ;;  %v271_v3 = vld [vmem:[%s1072_s10 + $0xe0] sm:$0xff]  ;;  %v270_v4 = vld [vmem:[%s1072_s10 + $0xd8] sm:$0xff]  ;;  %p575_p6 = scmp.ne.s32.totalorder %s860_s18, 0 }
  0x52   : > { %282 = vmatpush1.xpose.msra.mxu0 %v273_v1  ;;  %353 = vmatpush1.msra.mxu1 %v273_v1  ;;  %v269_v5 = vld [vmem:[%s1072_s10 + $0xd0] sm:$0xff]  ;;  %v268_v6 = vld [vmem:[%s1072_s10 + $0xc8] sm:$0xff]  ;;  %v267_v7 = vld [vmem:[%s1072_s10 + $0xc0] sm:$0xff] }
  0x53   : > { %283 = vmatprep.subr.mxu0 %v272_v2  ;;  %354 = vmatprep.subr.mxu1 %v272_v2  ;;  %v266_v8 = vld [vmem:[%s1072_s10 + $0xb8] sm:$0xff]  ;;  %v265_v9 = vld [vmem:[%s1072_s10 + $0xb0] sm:$0xff]  ;;  %v264_v11 = vld [vmem:[%s1072_s10 + $0xa8] sm:$0xff] }
  0x54   : > { %355 = vmatpush1.msra.mxu1 %v271_v3  ;;  %v242_v10 = vld [vmem:[%s1065_s8 + $0x8] sm:$0xff]  ;;  %v263_v12 = vld [vmem:[%s1072_s10 + $0xa0] sm:$0xff]  ;;  %v261_v14 = vld [vmem:[%s1072_s10 + $0x90] sm:$0xff]  ;;  %416 = vmatprep.mubr.f32.mxu1 %v882_v34 }
  0x55   : > { %356 = vmatprep.subr.mxu1 %v270_v4  ;;  %345 = vmatprep.mubr.f32.mxu0 %v242_v10  ;;  %v262_v13 = vld [vmem:[%s1072_s10 + $0x98] sm:$0xff]  ;;  %v260_v15 = vld [vmem:[%s1072_s10 + $0x88] sm:$0xff]  ;;  %v259_v16 = vld [vmem:[%s1072_s10 + $0x80] sm:$0xff] }
  0x56   : > { %284 = vmatpush1.xpose.msra.mxu0 %v271_v3  ;;  %357 = vmatpush1.msra.mxu1 %v269_v5  ;;  %v258_v17 = vld [vmem:[%s1072_s10 + $0x78] sm:$0xff]  ;;  %v257_v18 = vld [vmem:[%s1072_s10 + $0x70] sm:$0xff]  ;;  %v256_v19 = vld [vmem:[%s1072_s10 + $0x68] sm:$0xff] }
  0x57   : > { %285 = vmatprep.subr.mxu0 %v270_v4  ;;  %358 = vmatprep.subr.mxu1 %v268_v6  ;;  %v255_v20 = vld [vmem:[%s1072_s10 + $0x60] sm:$0xff]  ;;  %v254_v21 = vld [vmem:[%s1072_s10 + $0x58] sm:$0xff]  ;;  %v253_v22 = vld [vmem:[%s1072_s10 + $0x50] sm:$0xff] }
  0x58   : > { %359 = vmatpush1.msra.mxu1 %v267_v7  ;;  %v252_v23 = vld [vmem:[%s1072_s10 + $0x48] sm:$0xff]  ;;  %v251_v24 = vld [vmem:[%s1072_s10 + $0x40] sm:$0xff]  ;;  %v250_v25 = vld [vmem:[%s1072_s10 + $0x38] sm:$0xff] }
  0x59   : > { %360 = vmatprep.subr.mxu1 %v266_v8  ;;  %v249_v26 = vld [vmem:[%s1072_s10 + $0x30] sm:$0xff]  ;;  %v248_v27 = vld [vmem:[%s1072_s10 + $0x28] sm:$0xff]  ;;  %v247_v28 = vld [vmem:[%s1072_s10 + $0x20] sm:$0xff] }
  0x5a   : > { %286 = vmatpush1.xpose.msra.mxu0 %v269_v5  ;;  %361 = vmatpush1.msra.mxu1 %v265_v9  ;;  %v246_v29 = vld [vmem:[%s1072_s10 + $0x18] sm:$0xff]  ;;  %v245_v30 = vld [vmem:[%s1072_s10 + $0x10] sm:$0xff]  ;;  %v244_v31 = vld [vmem:[%s1072_s10 + $0x8] sm:$0xff] }
  0x5b   : > { %287 = vmatprep.subr.mxu0 %v268_v6  ;;  %362 = vmatprep.subr.mxu1 %v264_v11  ;;  %v243_v32 = vld [vmem:[%s1072_s10] sm:$0xff] }
  0x5c   : > { %363 = vmatpush1.msra.mxu1 %v263_v12  ;;  %v241_v33 = vld [vmem:[%s1065_s8] sm:$0xff] }
  0x5d   : > { %364 = vmatprep.subr.mxu1 %v262_v13  ;;  %v574_v35 = vld [vmem:[%s275_s7] ss:$0 sm:$0xff] }
  0x5e   : > { %288 = vmatpush1.xpose.msra.mxu0 %v267_v7  ;;  %365 = vmatpush1.msra.mxu1 %v261_v14 }
  0x5f   : > { %289 = vmatprep.subr.mxu0 %v266_v8  ;;  %366 = vmatprep.subr.mxu1 %v260_v15 }
  0x60   : > { %367 = vmatpush1.msra.mxu1 %v259_v16 }
  0x61   : > { %368 = vmatprep.subr.mxu1 %v258_v17 }
  0x62   : > { %290 = vmatpush1.xpose.msra.mxu0 %v265_v9  ;;  %369 = vmatpush1.msra.mxu1 %v257_v18 }
  0x63   : > { %291 = vmatprep.subr.mxu0 %v264_v11  ;;  %370 = vmatprep.subr.mxu1 %v256_v19 }
  0x64   : > { %371 = vmatpush1.msra.mxu1 %v255_v20 }
  0x65   : > { %372 = vmatprep.subr.mxu1 %v254_v21 }
  0x66   : > { %292 = vmatpush1.xpose.msra.mxu0 %v263_v12  ;;  %373 = vmatpush1.msra.mxu1 %v253_v22 }
  0x67   : > { %293 = vmatprep.subr.mxu0 %v262_v13  ;;  %374 = vmatprep.subr.mxu1 %v252_v23 }
  0x68   : > { %375 = vmatpush1.msra.mxu1 %v251_v24 }
  0x69   : > { %376 = vmatprep.subr.mxu1 %v250_v25 }
  0x6a   : > { %294 = vmatpush1.xpose.msra.mxu0 %v261_v14  ;;  %377 = vmatpush1.msra.mxu1 %v249_v26 }
  0x6b   : > { %295 = vmatprep.subr.mxu0 %v260_v15  ;;  %378 = vmatprep.subr.mxu1 %v248_v27 }
  0x6c   : > { %379 = vmatpush1.msra.mxu1 %v247_v28 }
  0x6d   : > { %380 = vmatprep.subr.mxu1 %v246_v29 }
  0x6e   : > { %296 = vmatpush1.xpose.msra.mxu0 %v259_v16  ;;  %381 = vmatpush1.msra.mxu1 %v245_v30 }
  0x6f   : > { %297 = vmatprep.subr.mxu0 %v258_v17  ;;  %382 = vmatprep.subr.mxu1 %v244_v31 }
  0x70   : > { %383 = vmatpush1.msra.mxu1 %v243_v32 }
  0x72   : > { %298 = vmatpush1.xpose.msra.mxu0 %v257_v18 }
  0x73   : > { %299 = vmatprep.subr.mxu0 %v256_v19 }
  0x76   : > { %300 = vmatpush1.xpose.msra.mxu0 %v255_v20 }
  0x77   : > { %301 = vmatprep.subr.mxu0 %v254_v21 }
  0x7a   : > { %302 = vmatpush1.xpose.msra.mxu0 %v253_v22 }
  0x7b   : > { %303 = vmatprep.subr.mxu0 %v252_v23 }
  0x7e   : > { %304 = vmatpush1.xpose.msra.mxu0 %v251_v24 }
  0x7f   : > { %305 = vmatprep.subr.mxu0 %v250_v25 }
  0x82   : > { %306 = vmatpush1.xpose.msra.mxu0 %v249_v26 }
  0x83   : > { %307 = vmatprep.subr.mxu0 %v248_v27 }
  0x86   : > { %308 = vmatpush1.xpose.msra.mxu0 %v247_v28 }
  0x87   : > { %309 = vmatprep.subr.mxu0 %v246_v29 }
  0x8a   : > { %310 = vmatpush1.xpose.msra.mxu0 %v245_v30 }
  0x8b   : > { %311 = vmatprep.subr.mxu0 %v244_v31 }
  0x8e   : > { %312 = vmatpush1.xpose.msra.mxu0 %v243_v32 }
  0x91   : > { %346 = vmatmul.mubr.f32.vlgmr.msra.gmra.mxu0 %v241_v33 }
 0x151   : > { %v347_v36 = vpop.f32.mrf.mxu0 }
 0x152   : > { %v348_v37 = vadd.f32 %v574_v35, %v347_v36 }
 0x153   : > { %v349_v38 = vpop.f32.mrf.mxu0 }
 0x154   : > { %v351_v39 = vmax.f32 %v348_v37, 0.0 }
 0x156   : > { %417 = vmatmul.mubr.f32.vlgmr.msra.gmra.mxu1 %v351_v39 }
 0x214   : > { %426 = sbr.rel (%p575_p6) target bundleno = 538 (0x21a), region = 44 }
 0x216   : > { %v418_v40 = vpop.f32.mrf.mxu1 }
 0x218   : > { %v420_v41 = vpop.f32.mrf.mxu1 }
 0x219   : > { %427 = vst [vmem:[%s239_s11] sm:$0xff] %v418_v40  ;;  %428 = vst [vmem:[%s239_s11 + $0x8] sm:$0xff] %v420_v41 }
 0x21a PF: > { %p576_p1 = scmp.eq.s32.totalorder %s860_s18, 0 }
 0x21c   : > { %432 = sbr.rel (%p576_p1) target bundleno = 549 (0x225), region = 48 }
 0x221   : > { %v433_v42 = vld [vmem:[%s239_s11] sm:$0xff]  ;;  %v434_v43 = vld [vmem:[%s239_s11 + $0x8] sm:$0xff] }
 0x222   : > { %v435_v44 = vadd.f32 %v433_v42, %v418_v40  ;;  %v436_v45 = vadd.f32 %v434_v43, %v420_v41 }
 0x224   : > { %437 = vst [vmem:[%s239_s11] sm:$0xff] %v435_v44  ;;  %438 = vst [vmem:[%s239_s11 + $0x8] sm:$0xff] %v436_v45 }
 0x225 PF: > { %s585_s24 = sshll.u32 %s864_s19, 8  ;;  %s1205_s15 = sld [smem:[#allocation16_spill]] }
 0x226   : > { %s454_s12 = sshll.u32 %s239_s11, 4  ;;  %s440_s8 = scalar_lea.sflag [#allocation4], %s1059_s29  ;;  %s455_s12 = int_to_ptr.vmem [resolvable:$true] %s454_s12 }
 0x227   : > { %s752_s18 = scalar_lea.vmem %s455_s12, 256  ;;  %p1207_p13 = scmp.ne.s32.totalorder %s1194_s4, 0 }
 0x228   : > { %p753_p12 = scmp.ne.s32.totalorder %s455_s12, %s752_s18  ;;  %s883_s0 = smov [#allocation7]  }
 0x229   : > { %s756_s26 = sshll.u32 %s883_s0, 4  ;;  %s757_s26 = int_to_ptr.vmem [resolvable:$false] %s756_s26 }
 0x22a   : > { %p754_p3 = pnand %p753_p12, %p1207_p13  ;;  %s758_s6 = scalar_lea.vmem %s757_s26, 512 }
 0x22b   : > { %s1206_s27 = smov %s1205_s15  ;;  %s452_s22 = scalar_lea.hbm %s1205_s15, %s585_s24 }
 0x22c   : > { %p755_p2 = pneg %p754_p3  ;;  %p759_p5 = scmp.lt.s32.totalorder %s455_s12, %s757_s26 }
 0x22d   : > { %p760_p7 = scmp.lt.s32.totalorder %s758_s6, %s752_s18 }
 0x22f   : > { %p761_p9 = por %p760_p7, %p759_p5 }
 0x231   : > { %p762_p11 = pnand %p761_p9, %p755_p2 }
 0x233   : > { %765 = shalt.err (!%p762_p11)
}
 0x234   : > { %s766_s19 = scalar_lea.hbm %s452_s22, 256  ;;  %s770_s28 = scalar_lea.hbm %s1206_s27, 1024 }
 0x235   : > { %p767_p4 = scmp.ne.s32.totalorder %s452_s22, %s766_s19  ;;  %p771_p0 = scmp.lt.s32.totalorder %s452_s22, %s1206_s27 }
 0x236   : > { %p772_p6 = scmp.lt.s32.totalorder %s770_s28, %s766_s19 }
 0x237   : > { %p768_p8 = pnand %p767_p4, %p1207_p13 }
 0x238   : > { %p773_p1 = por %p772_p6, %p771_p0 }
 0x239   : > { %p769_p10 = pneg %p768_p8 }
 0x23b   : > { %p774_p12 = pnand %p773_p1, %p769_p10 }
 0x23d   : > { %777 = shalt.err (!%p774_p12)
}
 0x23e   : > { %590 = dma.vmem_to_hbm [thread:$0]  (%p1207_p13), %s455_s12, 256, %s452_s22, %s440_s8  }
 0x23f PF: > { %s1208_s11 = sld [smem:[#allocation12_spill]] }
 0x240   : > { %s1209_s24 = sld [smem:[#allocation11_spill]] }
 0x241   : > { %s1210_s9 = sld [smem:[#allocation13_spill]] }
 0x245   : > { %p604_p3 = scmp.ge.s32.totalorder %s1208_s11, 2 }
 0x246   : > { %s466_s23 = sand.u32 1, %s1209_s24  }
 0x247   : > { %p1211_p2 = scmp.ne.s32.totalorder %s1210_s9, 0  ;;  %s467_s15 = scalar_lea.sflag [#allocation4], %s466_s23 }
 0x249   : > { %p600_p5 = pnand %p604_p3, %p1211_p2 }
 0x24b   : > { %p601_p7 = pneg %p600_p5 }
 0x24d   : > { %831 = dma.done.wait (%p601_p7), %s467_s15, 256  }
 0x24e   : > { %833 = vsyncadd (%p601_p7), %s467_s15, 4294967040  ;;  %s22_s22 = sadd.s32 1, %s1208_s11   ;;  %s1212_s4 = sld [smem:[#allocation14_spill]] }
 0x24f   : > { %p19_p9 = scmp.ge.s32.totalorder %s22_s22, 10   ;;  %s1213_s12 = smov %s840_s13 }
 0x250   : > { %s1214_s13 = smov %s844_s14  ;;  %s1215_s14 = smov %s1042_s5 }
 0x251   : > { %s1216_s15 = smov %s852_s16  ;;  %s1217_s16 = smov %s856_s17 }
 0x252   : > { %s1218_s17 = smov %s1049_s3  ;;  %s1219_s18 = smov %s868_s20 }
 0x253   : > { %s1220_s19 = smov %s872_s21  ;;  %s1222_s21 = smov %s1228_s25 }
 0x254   : > { %s1221_s20 = smov %s1212_s4  ;;  %21 = sbr.rel (!%p19_p9) target bundleno = 14 (0xe), region = 99 }
 0x259   :  { %472 = vsyncpa [#allocation3], 1 }
 0x25a   :  { %474 = vsyncpa [#allocation3 + $0x1], 1 }
 0x25b   :  { %475 = vsyncpa [#allocation6], 1 }
 0x25c   :  { %477 = vsyncpa [#allocation6 + $0x1], 1 }
 0x25d   :  { %478 = vsyncpa [#allocation4], 1 }
 0x25e   :  { %480 = vsyncpa [#allocation4 + $0x1], 1 }

</bundles_post_ra>
